<compile_context>
chip_gen: v7x
topology: tpu7x:2x2x1
jax: 0.10.0
libtpu: 0.0.40
codegen_flags: <defaults>
</compile_context>

<pallas_src>
import jax
import jax.numpy as jnp
from jax.experimental import pallas as pl
from jax.experimental.pallas import tpu as pltpu

SUBLANE = 8        # f32 sublane rows: batch tile must be a multiple of this
MAX_TILE_B = 512   # cap so f32 h1/h2 intermediates stay out of spill territory


def _round_up(n: int, m: int) -> int:
    return ((n + m - 1) // m) * m


def _tensorcores_per_chip() -> int:
    """Best-effort TensorCore count (v5e/v6e: 1, v7x: 2).  Falls back to 1."""
    try:
        kind = jax.devices()[0].device_kind.lower()
    except Exception:
        return 1
    return 2 if "7" in kind else 1


def _sigmoid_ref(x):
    """Numerically-stable sigmoid with an exact divide (used by the references)."""
    z = jnp.exp(-jnp.abs(x))
    r = 1.0 / (1.0 + z)
    return jnp.where(x >= 0, r, z * r)


def _sigmoid_kernel(x):
    """Kernel-side sigmoid: exp and approximate reciprocal both land on the EUP slot."""
    z = jnp.exp(-jnp.abs(x))
    r = pl.reciprocal(1.0 + z, approx=True)
    return jnp.where(x >= 0, r, z * r)


def mlp_kernel(x_ref, w1_ref, b1_ref, w2_ref, b2_ref, w3_ref, b3_ref, o_ref):
    """One batch tile.  Weights bf16 (MXU operands); accumulation, biases, output f32."""
    x = x_ref[...].astype(jnp.bfloat16)                 # f32 -> bf16 cast in-kernel (VPU)

    # hidden1 + ReLU
    h1 = jnp.dot(x, w1_ref[...], preferred_element_type=jnp.float32)
    h1 = jnp.maximum(h1 + b1_ref[...], 0.0)

    # dropout (eval mode) -> identity

    # hidden2 + sigmoid
    h2 = jnp.dot(h1.astype(jnp.bfloat16), w2_ref[...],
                 preferred_element_type=jnp.float32)
    h2 = _sigmoid_kernel(h2 + b2_ref[...])

    # predict (no activation)
    out = jnp.dot(h2.astype(jnp.bfloat16), w3_ref[...],
                  preferred_element_type=jnp.float32)
    o_ref[...] = (out + b3_ref[...]).astype(o_ref.dtype)


def pack_params(w1, b1, w2, b2, w3, b3):
    """One-time parameter prep: bf16 weights, f32 (1, N) biases.

    Call this once at param-load time, NOT per forward call."""
    as_bias = lambda b: jnp.asarray(b, jnp.float32).reshape(1, -1)
    return (jnp.asarray(w1, jnp.bfloat16), as_bias(b1),
            jnp.asarray(w2, jnp.bfloat16), as_bias(b2),
            jnp.asarray(w3, jnp.bfloat16), as_bias(b3))


def mlp_forward(x, w1, b1, w2, b2, w3, b3):
    """Forward pass.  Expects pre-packed params from pack_params(); x is f32 (batch, n_input)."""
    batch, n_input = x.shape
    n_hidden = w1.shape[1]
    n_output = w3.shape[1]

    # Per-generation batch tiling: one grid step per TensorCore.  VMEM is a non-issue at
    # these sizes (<1 MiB/step); the binding constraints are MXU fill and per-step overhead.
    n_cores = _tensorcores_per_chip()
    tile_b = _round_up(max(1, pl.cdiv(batch, n_cores)), SUBLANE)
    tile_b = max(SUBLANE, min(tile_b, MAX_TILE_B))
    bp = _round_up(batch, tile_b)
    grid = (bp // tile_b,)

    if bp != batch:                        # pad batch rows only; feature dims stay unpadded
        x = jnp.pad(x, ((0, bp - batch), (0, 0)))

    resident = lambda i: (0, 0)            # same block every step -> stays resident in VMEM

    flops = 2 * bp * (n_input * n_hidden + n_hidden * n_hidden + n_hidden * n_output)
    bytes_accessed = (x.size * 4
                      + (w1.size + w2.size + w3.size) * 2
                      + (b1.size + b2.size + b3.size) * 4
                      + bp * n_output * 4)

    out = pl.pallas_call(
        mlp_kernel,
        out_shape=jax.ShapeDtypeStruct((bp, n_output), jnp.float32),
        grid=grid,
        in_specs=[
            pl.BlockSpec((tile_b, n_input), lambda i: (i, 0)),   # x: streamed per batch tile
            pl.BlockSpec((n_input, n_hidden), resident),         # W1
            pl.BlockSpec((1, n_hidden), resident),               # b1
            pl.BlockSpec((n_hidden, n_hidden), resident),        # W2
            pl.BlockSpec((1, n_hidden), resident),               # b2
            pl.BlockSpec((n_hidden, n_output), resident),        # W3
            pl.BlockSpec((1, n_output), resident),               # b3
        ],
        out_specs=pl.BlockSpec((tile_b, n_output), lambda i: (i, 0)),
        compiler_params=pltpu.CompilerParams(
            dimension_semantics=("parallel",)),                  # shard batch tiles across TCs
        cost_estimate=pl.CostEstimate(
            flops=flops,
            transcendentals=2 * bp * n_hidden,                   # sigmoid exp + approx recip
            bytes_accessed=bytes_accessed),
    )(x, w1, b1, w2, b2, w3, b3)

    return out[:batch] if bp != batch else out


def mlp_reference_bf16(x, w1, b1, w2, b2, w3, b3):
    """Pure-JAX reference on the kernel's bf16-operand / f32-accumulate path (exact divide)."""
    bf = jnp.bfloat16
    h1 = jnp.dot(x.astype(bf), w1.astype(bf), preferred_element_type=jnp.float32) + b1
    h1 = jnp.maximum(h1, 0.0)
    h2 = _sigmoid_ref(
        jnp.dot(h1.astype(bf), w2.astype(bf), preferred_element_type=jnp.float32) + b2)
    return jnp.dot(h2.astype(bf), w3.astype(bf), preferred_element_type=jnp.float32) + b3


def mlp_reference_f32(x, w1, b1, w2, b2, w3, b3):
    """Pure-f32 reference matching the PyTorch module exactly (eval mode)."""
    h1 = jnp.maximum(x @ w1 + b1, 0.0)
    h2 = _sigmoid_ref(h1 @ w2 + b2)
    return h2 @ w3 + b3


def init_params(key, n_input, n_hidden, n_output):
    """PyTorch nn.Linear-style init: uniform(-1/sqrt(fan_in), 1/sqrt(fan_in))."""
    ks = jax.random.split(key, 6)

    def lin(kw, kb, fan_in, fan_out):
        bound = 1.0 / jnp.sqrt(fan_in)
        w = jax.random.uniform(kw, (fan_in, fan_out), jnp.float32, -bound, bound)
        b = jax.random.uniform(kb, (1, fan_out), jnp.float32, -bound, bound)
        return w, b

    w1, b1 = lin(ks[0], ks[1], n_input, n_hidden)
    w2, b2 = lin(ks[2], ks[3], n_hidden, n_hidden)
    w3, b3 = lin(ks[4], ks[5], n_hidden, n_output)
    return w1, b1, w2, b2, w3, b3


if __name__ == "__main__":
    # Shapes consistent with the module; batch=256 exercises the batch-tiled grid
    # (1 tile on v5e/v6e, 2 tiles split across TensorCores on v7x).
    batch, n_input, n_hidden, n_output = 256, 32, 32, 4

    key = jax.random.PRNGKey(0)
    kx, kp = jax.random.split(key)

    x = jax.random.normal(kx, (batch, n_input), dtype=jnp.float32)
    w1, b1, w2, b2, w3, b3 = init_params(kp, n_input, n_hidden, n_output)

    packed = pack_params(w1, b1, w2, b2, w3, b3)   # one-time prep, outside the hot path
    fwd = jax.jit(mlp_forward)

    out = jax.block_until_ready(fwd(x, *packed))

    ref_bf16 = mlp_reference_bf16(x, w1, b1, w2, b2, w3, b3)
    ref_f32 = mlp_reference_f32(x, w1, b1, w2, b2, w3, b3)

    assert out.shape == (batch, n_output)
    assert jnp.allclose(out, ref_bf16, atol=1e-2, rtol=1e-2), (
        f"bf16-path max abs diff = {jnp.max(jnp.abs(out - ref_bf16))}")
    assert jnp.allclose(out, ref_f32, atol=5e-2, rtol=5e-2), (
        f"f32-ref max abs diff = {jnp.max(jnp.abs(out - ref_f32))}")

    print("KERNEL_OK")
</pallas_src>

<mosaic_0001>
module attributes {stable_mosaic.version = 11 : i64} {
  func.func @mlp_kernel(%arg0: i32, %arg1: memref<256x32xf32, #tpu.memory_space<vmem>>, %arg2: memref<32x32xbf16, #tpu.memory_space<vmem>>, %arg3: memref<1x32xf32, #tpu.memory_space<vmem>>, %arg4: memref<32x32xbf16, #tpu.memory_space<vmem>>, %arg5: memref<1x32xf32, #tpu.memory_space<vmem>>, %arg6: memref<32x4xbf16, #tpu.memory_space<vmem>>, %arg7: memref<1x4xf32, #tpu.memory_space<vmem>>, %arg8: memref<256x4xf32, #tpu.memory_space<vmem>>) attributes {dimension_semantics = [#tpu.dimension_semantics<parallel>], iteration_bounds = array<i64: 1>, scalar_prefetch = 0 : i64, scratch_operands = 0 : i64, tpu.core_type = #tpu.core_type<tc>, window_params = [{transform_indices = @transform_0, window_bounds = array<i64: 256, 32>}, {pipeline_mode = #tpu.pipeline_mode<synchronous>, transform_indices = @transform_1, window_bounds = array<i64: 32, 32>}, {pipeline_mode = #tpu.pipeline_mode<synchronous>, transform_indices = @transform_2, window_bounds = array<i64: 1, 32>}, {pipeline_mode = #tpu.pipeline_mode<synchronous>, transform_indices = @transform_3, window_bounds = array<i64: 32, 32>}, {pipeline_mode = #tpu.pipeline_mode<synchronous>, transform_indices = @transform_4, window_bounds = array<i64: 1, 32>}, {pipeline_mode = #tpu.pipeline_mode<synchronous>, transform_indices = @transform_5, window_bounds = array<i64: 32, 4>}, {pipeline_mode = #tpu.pipeline_mode<synchronous>, transform_indices = @transform_6, window_bounds = array<i64: 1, 4>}, {transform_indices = @transform_7, window_bounds = array<i64: 256, 4>}]} {
    %c0 = arith.constant 0 : index
    %c0_0 = arith.constant 0 : index
    %0 = vector.load %arg1[%c0, %c0_0] : memref<256x32xf32, #tpu.memory_space<vmem>>, vector<256x32xf32>
    %1 = arith.truncf %0 : vector<256x32xf32> to vector<256x32xbf16>
    %c0_1 = arith.constant 0 : index
    %c0_2 = arith.constant 0 : index
    %2 = vector.load %arg2[%c0_1, %c0_2] : memref<32x32xbf16, #tpu.memory_space<vmem>>, vector<32x32xbf16>
    %cst = arith.constant dense<0.000000e+00> : vector<256x32xf32>
    %3 = tpu.matmul %1, %2, %cst {dimension_numbers = #tpu.dot_dimension_numbers<[1], [0], [0], [1], [0, 0, 1, 1], [], []>} : vector<256x32xbf16>, vector<32x32xbf16>, vector<256x32xf32> -> vector<256x32xf32>
    %c0_3 = arith.constant 0 : index
    %c0_4 = arith.constant 0 : index
    %4 = vector.load %arg3[%c0_3, %c0_4] : memref<1x32xf32, #tpu.memory_space<vmem>>, vector<1x32xf32>
    %5 = vector.broadcast %4 : vector<1x32xf32> to vector<256x32xf32>
    %6 = arith.addf %3, %5 : vector<256x32xf32>
    %cst_5 = arith.constant 0.000000e+00 : f32
    %7 = vector.broadcast %cst_5 : f32 to vector<256x32xf32>
    %8 = arith.maximumf %6, %7 : vector<256x32xf32>
    %9 = arith.truncf %8 : vector<256x32xf32> to vector<256x32xbf16>
    %c0_6 = arith.constant 0 : index
    %c0_7 = arith.constant 0 : index
    %10 = vector.load %arg4[%c0_6, %c0_7] : memref<32x32xbf16, #tpu.memory_space<vmem>>, vector<32x32xbf16>
    %cst_8 = arith.constant dense<0.000000e+00> : vector<256x32xf32>
    %11 = tpu.matmul %9, %10, %cst_8 {dimension_numbers = #tpu.dot_dimension_numbers<[1], [0], [0], [1], [0, 0, 1, 1], [], []>} : vector<256x32xbf16>, vector<32x32xbf16>, vector<256x32xf32> -> vector<256x32xf32>
    %c0_9 = arith.constant 0 : index
    %c0_10 = arith.constant 0 : index
    %12 = vector.load %arg5[%c0_9, %c0_10] : memref<1x32xf32, #tpu.memory_space<vmem>>, vector<1x32xf32>
    %13 = vector.broadcast %12 : vector<1x32xf32> to vector<256x32xf32>
    %14 = arith.addf %11, %13 : vector<256x32xf32>
    %15 = math.absf %14 : vector<256x32xf32>
    %cst_11 = arith.constant 0.000000e+00 : f32
    %16 = vector.broadcast %cst_11 : f32 to vector<256x32xf32>
    %17 = arith.subf %16, %15 : vector<256x32xf32>
    %18 = math.exp %17 : vector<256x32xf32>
    %cst_12 = arith.constant 1.000000e+00 : f32
    %19 = vector.broadcast %cst_12 : f32 to vector<256x32xf32>
    %20 = arith.addf %19, %18 : vector<256x32xf32>
    %21 = tpu.reciprocal %20 {approx = true} : vector<256x32xf32> -> vector<256x32xf32>
    %cst_13 = arith.constant 0.000000e+00 : f32
    %22 = vector.broadcast %cst_13 : f32 to vector<256x32xf32>
    %23 = arith.cmpf oge, %14, %22 : vector<256x32xf32>
    %24 = arith.mulf %18, %21 : vector<256x32xf32>
    %25 = arith.select %23, %21, %24 : vector<256x32xi1>, vector<256x32xf32>
    %26 = arith.truncf %25 : vector<256x32xf32> to vector<256x32xbf16>
    %c0_14 = arith.constant 0 : index
    %c0_15 = arith.constant 0 : index
    %27 = vector.load %arg6[%c0_14, %c0_15] : memref<32x4xbf16, #tpu.memory_space<vmem>>, vector<32x4xbf16>
    %cst_16 = arith.constant dense<0.000000e+00> : vector<256x4xf32>
    %28 = tpu.matmul %26, %27, %cst_16 {dimension_numbers = #tpu.dot_dimension_numbers<[1], [0], [0], [1], [0, 0, 1, 1], [], []>} : vector<256x32xbf16>, vector<32x4xbf16>, vector<256x4xf32> -> vector<256x4xf32>
    %c0_17 = arith.constant 0 : index
    %c0_18 = arith.constant 0 : index
    %29 = vector.load %arg7[%c0_17, %c0_18] : memref<1x4xf32, #tpu.memory_space<vmem>>, vector<1x4xf32>
    %30 = vector.broadcast %29 : vector<1x4xf32> to vector<256x4xf32>
    %31 = arith.addf %28, %30 : vector<256x4xf32>
    %c0_19 = arith.constant 0 : index
    %c0_20 = arith.constant 0 : index
    %32 = vector.load %arg8[%c0_19, %c0_20] : memref<256x4xf32, #tpu.memory_space<vmem>>, vector<256x4xf32>
    tpu.vector_store %arg8[%c0_19, %c0_20], %31 {strides = array<i32>} : memref<256x4xf32, #tpu.memory_space<vmem>>, vector<256x4xf32>,
    return
  }
  func.func @transform_0(%arg0: i32) -> (i32, i32) {
    %c0_i32 = arith.constant 0 : i32
    %c0_i32_0 = arith.constant 0 : i32
    return %arg0, %c0_i32 : i32, i32
  }
  func.func @transform_1(%arg0: i32) -> (i32, i32) {
    %c0_i32 = arith.constant 0 : i32
    %c0_i32_0 = arith.constant 0 : i32
    %c0_i32_1 = arith.constant 0 : i32
    return %c0_i32, %c0_i32_0 : i32, i32
  }
  func.func @transform_2(%arg0: i32) -> (i32, i32) {
    %c0_i32 = arith.constant 0 : i32
    %c0_i32_0 = arith.constant 0 : i32
    %c0_i32_1 = arith.constant 0 : i32
    return %c0_i32, %c0_i32_0 : i32, i32
  }
  func.func @transform_3(%arg0: i32) -> (i32, i32) {
    %c0_i32 = arith.constant 0 : i32
    %c0_i32_0 = arith.constant 0 : i32
    %c0_i32_1 = arith.constant 0 : i32
    return %c0_i32, %c0_i32_0 : i32, i32
  }
  func.func @transform_4(%arg0: i32) -> (i32, i32) {
    %c0_i32 = arith.constant 0 : i32
    %c0_i32_0 = arith.constant 0 : i32
    %c0_i32_1 = arith.constant 0 : i32
    return %c0_i32, %c0_i32_0 : i32, i32
  }
  func.func @transform_5(%arg0: i32) -> (i32, i32) {
    %c0_i32 = arith.constant 0 : i32
    %c0_i32_0 = arith.constant 0 : i32
    %c0_i32_1 = arith.constant 0 : i32
    return %c0_i32, %c0_i32_0 : i32, i32
  }
  func.func @transform_6(%arg0: i32) -> (i32, i32) {
    %c0_i32 = arith.constant 0 : i32
    %c0_i32_0 = arith.constant 0 : i32
    %c0_i32_1 = arith.constant 0 : i32
    return %c0_i32, %c0_i32_0 : i32, i32
  }
  func.func @transform_7(%arg0: i32) -> (i32, i32) {
    %c0_i32 = arith.constant 0 : i32
    %c0_i32_0 = arith.constant 0 : i32
    return %arg0, %c0_i32 : i32, i32
  }
}

</mosaic_0001>

<bundles_post_ra>
// kernel: mlp_forward.1
= control target key start
LH: loop header
LB: loop body
LE: loop exit
PB: predicated region body
PF: predicated region fallthrough
CT: control target
= control target key end

     0   :  { %vm98_vm0 = vcmask 261120   ;;  %s2221_s1 = inlined_call_operand.vmem [shape: bf16[32,32], index: 1, kind: input, shape index: {}]   ;;  %s2222_s0 = inlined_call_operand.vmem [shape: f32[256,32], index: 0, kind: input, shape index: {}]   ;;  %s2223_s3 = inlined_call_operand.vmem [shape: bf16[32,32], index: 3, kind: input, shape index: {}]   ;;  %s2224_s2 = inlined_call_operand.vmem [shape: f32[1,32], index: 2, kind: input, shape index: {}]   ;;  %s2225_s5 = inlined_call_operand.vmem [shape: bf16[32,4], index: 5, kind: input, shape index: {}]   ;;  %s2226_s4 = inlined_call_operand.vmem [shape: f32[1,32], index: 4, kind: input, shape index: {}]   ;;  %s2227_s6 = inlined_call_operand.vmem [shape: f32[1,4], index: 6, kind: input, shape index: {}]   ;;  %s2228_s7 = inlined_call_operand.vmem [shape: f32[256,4], index: 7, kind: output, shape index: {}]  }
   0x1   :  { %v1384_v0 = vld [vmem:[%s2221_s1] sm:$0xff]   ;;  %v1385_v1 = vld [vmem:[%s2221_s1 + $0x8] sm:$0xff]   ;;  %v29_v5 = vld [vmem:[%s2222_s0 + $0x10] sm:$0xff] }
   0x2   :  { %1272 = vmatprep.subr.bf16.mxu0 %v1384_v0  ;;  %v27_v2 = vld [vmem:[%s2222_s0] sm:$0xff]  ;;  %v28_v3 = vld [vmem:[%s2222_s0 + $0x8] sm:$0xff]  ;;  %1380 = vmatprep.subr.bf16.mxu1 %v1384_v0  ;;  %v30_v6 = vld [vmem:[%s2222_s0 + $0x18] sm:$0xff] }
   0x3   :  { %1273 = vmatpush3.bf16.msra.mxu0 %v1384_v0  ;;  %v59_v4 = vpack.c.bf16 %v28_v3, %v27_v2  ;;  %1382 = vmatpush3.bf16.msra.mxu1 %v1384_v0  ;;  %v31_v7 = vld [vmem:[%s2222_s0 + $0x20] sm:$0xff]  ;;  %v32_v8 = vld [vmem:[%s2222_s0 + $0x28] sm:$0xff]  ;;  %v60_v9 = vpack.c.bf16 %v30_v6, %v29_v5  ;;  %v45_v14 = vld [vmem:[%s2222_s0 + $0x90] sm:$0xff] }
   0x4   :  { %1274 = vmatprep.subr.bf16.mxu0 %v1385_v1  ;;  %1381 = vmatprep.subr.bf16.mxu1 %v1385_v1  ;;  %v61_v10 = vpack.c.bf16 %v32_v8, %v31_v7  ;;  %v43_v11 = vld [vmem:[%s2222_s0 + $0x80] sm:$0xff]  ;;  %v44_v12 = vld [vmem:[%s2222_s0 + $0x88] sm:$0xff]  ;;  %v46_v15 = vld [vmem:[%s2222_s0 + $0x98] sm:$0xff] }
   0x5   :  { %1276 = vmatprep.mubr.msk.bf16.mxu0 %vm98_vm0, %v59_v4  ;;  %v67_v13 = vpack.c.bf16 %v44_v12, %v43_v11  ;;  %v47_v16 = vld [vmem:[%s2222_s0 + $0xa0] sm:$0xff]  ;;  %v68_v17 = vpack.c.bf16 %v46_v15, %v45_v14  ;;  %v48_v18 = vld [vmem:[%s2222_s0 + $0xa8] sm:$0xff]  ;;  %v33_v19 = vld [vmem:[%s2222_s0 + $0x30] sm:$0xff] }
   0x6   :  { %v34_v20 = vld [vmem:[%s2222_s0 + $0x38] sm:$0xff]  ;;  %v35_v21 = vld [vmem:[%s2222_s0 + $0x40] sm:$0xff]  ;;  %v69_v22 = vpack.c.bf16 %v48_v18, %v47_v16  ;;  %v36_v23 = vld [vmem:[%s2222_s0 + $0x48] sm:$0xff] }
   0x7   :  { %1275 = vmatpush3.bf16.msra.mxu0 %v1385_v1  ;;  %1383 = vmatpush3.bf16.msra.mxu1 %v1385_v1  ;;  %v49_v24 = vld [vmem:[%s2222_s0 + $0xb0] sm:$0xff]  ;;  %v50_v25 = vld [vmem:[%s2222_s0 + $0xb8] sm:$0xff]  ;;  %v51_v26 = vld [vmem:[%s2222_s0 + $0xc0] sm:$0xff]  ;;  %v62_v29 = vpack.c.bf16 %v34_v20, %v33_v19  ;;  %v63_v31 = vpack.c.bf16 %v36_v23, %v35_v21 }
   0x8   :  { %1292 = vmatprep.mubr.msk.bf16.mxu1 %vm98_vm0, %v67_v13  ;;  %v52_v27 = vld [vmem:[%s2222_s0 + $0xc8] sm:$0xff]  ;;  %v1386_v28 = vld [vmem:[%s2223_s3] sm:$0xff]   ;;  %v70_v32 = vpack.c.bf16 %v50_v25, %v49_v24  ;;  %v37_v34 = vld [vmem:[%s2222_s0 + $0x50] sm:$0xff] }
   0x9   :  { %v1387_v30 = vld [vmem:[%s2223_s3 + $0x8] sm:$0xff]   ;;  %1308 = vmatprep.subr.bf16.mxu1 %v1386_v28  ;;  %v71_v33 = vpack.c.bf16 %v52_v27, %v51_v26  ;;  %v38_v35 = vld [vmem:[%s2222_s0 + $0x58] sm:$0xff]  ;;  %v39_v36 = vld [vmem:[%s2222_s0 + $0x60] sm:$0xff] }
   0xa   :  { %1277 = vmatmul.mubr.msk.bf16.vlgmr.msra.gmra.mrb[0].mxu0 %vm98_vm0, %v60_v9  ;;  %1293 = vmatmul.mubr.msk.bf16.vlgmr.msra.gmra.mrb[0].mxu1 %vm98_vm0, %v68_v17  ;;  %v40_v37 = vld [vmem:[%s2222_s0 + $0x68] sm:$0xff]  ;;  %v53_v38 = vld [vmem:[%s2222_s0 + $0xd0] sm:$0xff]  ;;  %v54_v39 = vld [vmem:[%s2222_s0 + $0xd8] sm:$0xff]  ;;  %v64_v42 = vpack.c.bf16 %v38_v35, %v37_v34 }
   0xb   :  { %1280 = vmatprep.mubr.msk.bf16.mxu0 %vm98_vm0, %v61_v10  ;;  %1296 = vmatprep.mubr.msk.bf16.mxu1 %vm98_vm0, %v69_v22  ;;  %v55_v40 = vld [vmem:[%s2222_s0 + $0xe0] sm:$0xff]  ;;  %v56_v41 = vld [vmem:[%s2222_s0 + $0xe8] sm:$0xff]  ;;  %v65_v43 = vpack.c.bf16 %v40_v37, %v39_v36  ;;  %v72_v44 = vpack.c.bf16 %v54_v39, %v53_v38  ;;  %v41_v46 = vld [vmem:[%s2222_s0 + $0x70] sm:$0xff] }
   0xc   :  { %1309 = vmatpush3.bf16.msra.mxu1 %v1386_v28  ;;  %v73_v45 = vpack.c.bf16 %v56_v41, %v55_v40  ;;  %v42_v47 = vld [vmem:[%s2222_s0 + $0x78] sm:$0xff]  ;;  %v57_v48 = vld [vmem:[%s2222_s0 + $0xf0] sm:$0xff]  ;;  %v1685_v52 = vld [vmem:[%s2224_s2] ss:$0 sm:$0xff] }
   0xd   :  { %1310 = vmatprep.subr.bf16.mxu1 %v1387_v30  ;;  %v58_v49 = vld [vmem:[%s2222_s0 + $0xf8] sm:$0xff]  ;;  %v66_v50 = vpack.c.bf16 %v42_v47, %v41_v46 }
   0xe   :  { %v74_v51 = vpack.c.bf16 %v58_v49, %v57_v48 }
  0x10   :  { %1311 = vmatpush3.bf16.msra.mxu1 %v1387_v30 }
  0x12   :  { %1281 = vmatmul.mubr.msk.bf16.gmra.mrb[4].mxu0 %vm98_vm0, %v62_v29  ;;  %1297 = vmatmul.mubr.msk.bf16.gmra.mrb[4].mxu1 %vm98_vm0, %v70_v32 }
  0x13   :  { %1284 = vmatprep.mubr.msk.bf16.mxu0 %vm98_vm0, %v63_v31  ;;  %1300 = vmatprep.mubr.msk.bf16.mxu1 %vm98_vm0, %v71_v33 }
  0x1a   :  { %1285 = vmatmul.mubr.msk.bf16.gmra.mrb[8].mxu0 %vm98_vm0, %v64_v42  ;;  %1301 = vmatmul.mubr.msk.bf16.gmra.mrb[8].mxu1 %vm98_vm0, %v72_v44 }
  0x1b   :  { %1288 = vmatprep.mubr.msk.bf16.mxu0 %vm98_vm0, %v65_v43  ;;  %1304 = vmatprep.mubr.msk.bf16.mxu1 %vm98_vm0, %v73_v45 }
  0x22   :  { %1289 = vmatmul.mubr.msk.bf16.gmra.mrb[12].mxu0 %vm98_vm0, %v66_v50  ;;  %1305 = vmatmul.mubr.msk.bf16.gmra.mrb[12].mxu1 %vm98_vm0, %v74_v51 }
  0xdd   :  { %v1278_v53 = vpop.f32.mrb[0].mxu0  ;;  %v1294_v56 = vpop.f32.mrb[0].mxu1 }
  0xde   :  { %v190_v54 = vadd.f32 %v1278_v53, %v1685_v52  ;;  %v181_v55 = vpop.f32.mrb[1].mxu0  ;;  %v254_v59 = vadd.f32 %v1294_v56, %v1685_v52  ;;  %v245_v60 = vpop.f32.mrb[1].mxu1 }
  0xdf   :  { %v182_v57 = vadd.f32 %v1685_v52, %v181_v55  ;;  %v1279_v58 = vpop.f32.mrb[2].mxu0  ;;  %v246_v63 = vadd.f32 %v1685_v52, %v245_v60  ;;  %v1295_v0 = vpop.f32.mrb[2].mxu1 }
  0xe0   :  { %v193_v61 = vadd.f32 %v1279_v58, %v1685_v52  ;;  %v184_v62 = vpop.f32.mrb[3].mxu0  ;;  %v326_v2 = vmax.f32 %v254_v59, 0.0  ;;  %v257_v3 = vadd.f32 %v1295_v0, %v1685_v52  ;;  %v248_v4 = vpop.f32.mrb[3].mxu1  ;;  %v310_v5 = vmax.f32 %v190_v54, 0.0 }
  0xe1   :  { %v185_v1 = vadd.f32 %v1685_v52, %v184_v62  ;;  %v324_v7 = vmax.f32 %v246_v63, 0.0  ;;  %v249_v8 = vadd.f32 %v1685_v52, %v248_v4  ;;  %v308_v9 = vmax.f32 %v182_v57, 0.0 }
  0xe2   :  { %v311_v6 = vmax.f32 %v193_v61, 0.0  ;;  %v327_v11 = vmax.f32 %v257_v3, 0.0 }
  0xe3   :  { %v309_v10 = vmax.f32 %v185_v1, 0.0  ;;  %v325_v13 = vmax.f32 %v249_v8, 0.0 }
  0xe4   :  { %v341_v12 = vpack.c.bf16 %v311_v6, %v310_v5  ;;  %v1695_v16 = vpack.c.bf16 %v327_v11, %v326_v2 }
  0xe5   :  { %v340_v14 = vpack.c.bf16 %v309_v10, %v308_v9  ;;  %v1282_v15 = vpop.f32.mrb[4].mxu0  ;;  %v1698_v19 = vpack.c.bf16 %v325_v13, %v324_v7  ;;  %v1298_v20 = vpop.f32.mrb[4].mxu1 }
  0xe6   :  { %v206_v17 = vadd.f32 %v1282_v15, %v1685_v52  ;;  %v197_v18 = vpop.f32.mrb[5].mxu0  ;;  %v270_v23 = vadd.f32 %v1298_v20, %v1685_v52  ;;  %v261_v24 = vpop.f32.mrb[5].mxu1 }
  0xe7   :  { %v198_v21 = vadd.f32 %v1685_v52, %v197_v18  ;;  %v1283_v22 = vpop.f32.mrb[6].mxu0  ;;  %1312 = vmatprep.mubr.msk.bf16.mxu1 %vm98_vm0, %v340_v14  ;;  %v262_v27 = vadd.f32 %v1685_v52, %v261_v24  ;;  %v1299_v28 = vpop.f32.mrb[6].mxu1 }
  0xe8   :  { %v209_v25 = vadd.f32 %v1283_v22, %v1685_v52  ;;  %v200_v26 = vpop.f32.mrb[7].mxu0  ;;  %1313 = vmatmul.mubr.msk.bf16.vlgmr.msra.gmra.mrb[16].mxu1 %vm98_vm0, %v341_v12  ;;  %v330_v30 = vmax.f32 %v270_v23, 0.0  ;;  %v273_v31 = vadd.f32 %v1299_v28, %v1685_v52  ;;  %v264_v32 = vpop.f32.mrb[7].mxu1  ;;  %v314_v33 = vmax.f32 %v206_v17, 0.0 }
  0xe9   :  { %v201_v29 = vadd.f32 %v1685_v52, %v200_v26  ;;  %v328_v35 = vmax.f32 %v262_v27, 0.0  ;;  %v265_v36 = vadd.f32 %v1685_v52, %v264_v32  ;;  %v312_v37 = vmax.f32 %v198_v21, 0.0 }
  0xea   :  { %v315_v34 = vmax.f32 %v209_v25, 0.0  ;;  %v331_v39 = vmax.f32 %v273_v31, 0.0 }
  0xeb   :  { %v313_v38 = vmax.f32 %v201_v29, 0.0  ;;  %v329_v41 = vmax.f32 %v265_v36, 0.0 }
  0xec   :  { %v343_v40 = vpack.c.bf16 %v315_v34, %v314_v33  ;;  %v1709_v44 = vpack.c.bf16 %v331_v39, %v330_v30 }
  0xed   :  { %v342_v42 = vpack.c.bf16 %v313_v38, %v312_v37  ;;  %v1286_v43 = vpop.f32.mrb[8].mxu0  ;;  %v350_v47 = vpack.c.bf16 %v329_v41, %v328_v35  ;;  %v1302_v48 = vpop.f32.mrb[8].mxu1 }
  0xee   :  { %v222_v45 = vadd.f32 %v1286_v43, %v1685_v52  ;;  %v213_v46 = vpop.f32.mrb[9].mxu0  ;;  %v286_v51 = vadd.f32 %v1302_v48, %v1685_v52  ;;  %v277_v53 = vpop.f32.mrb[9].mxu1 }
  0xef   :  { %v214_v49 = vadd.f32 %v1685_v52, %v213_v46  ;;  %v1287_v50 = vpop.f32.mrb[10].mxu0  ;;  %1316 = vmatprep.mubr.msk.bf16.mxu1 %vm98_vm0, %v342_v42  ;;  %v278_v56 = vadd.f32 %v1685_v52, %v277_v53  ;;  %v1303_v57 = vpop.f32.mrb[10].mxu1 }
  0xf0   :  { %v225_v54 = vadd.f32 %v1287_v50, %v1685_v52  ;;  %v216_v55 = vpop.f32.mrb[11].mxu0  ;;  %1317 = vmatmul.mubr.msk.bf16.gmra.mrb[20].mxu1 %vm98_vm0, %v343_v40  ;;  %v334_v59 = vmax.f32 %v286_v51, 0.0  ;;  %v289_v60 = vadd.f32 %v1303_v57, %v1685_v52  ;;  %v280_v61 = vpop.f32.mrb[11].mxu1  ;;  %v318_v62 = vmax.f32 %v222_v45, 0.0 }
  0xf1   :  { %v217_v58 = vadd.f32 %v1685_v52, %v216_v55  ;;  %v332_v0 = vmax.f32 %v278_v56, 0.0  ;;  %v281_v1 = vadd.f32 %v1685_v52, %v280_v61  ;;  %v316_v2 = vmax.f32 %v214_v49, 0.0 }
  0xf2   :  { %v319_v63 = vmax.f32 %v225_v54, 0.0  ;;  %v335_v4 = vmax.f32 %v289_v60, 0.0 }
  0xf3   :  { %v317_v3 = vmax.f32 %v217_v58, 0.0  ;;  %v333_v6 = vmax.f32 %v281_v1, 0.0 }
  0xf4   :  { %v345_v5 = vpack.c.bf16 %v319_v63, %v318_v62  ;;  %v353_v9 = vpack.c.bf16 %v335_v4, %v334_v59 }
  0xf5   :  { %v344_v7 = vpack.c.bf16 %v317_v3, %v316_v2  ;;  %v1290_v8 = vpop.f32.mrb[12].mxu0  ;;  %v352_v12 = vpack.c.bf16 %v333_v6, %v332_v0  ;;  %v1306_v13 = vpop.f32.mrb[12].mxu1 }
  0xf6   :  { %v238_v10 = vadd.f32 %v1290_v8, %v1685_v52  ;;  %v229_v11 = vpop.f32.mrb[13].mxu0  ;;  %v302_v17 = vadd.f32 %v1306_v13, %v1685_v52  ;;  %v293_v18 = vpop.f32.mrb[13].mxu1 }
  0xf7   :  { %v230_v14 = vadd.f32 %v1685_v52, %v229_v11  ;;  %v1291_v15 = vpop.f32.mrb[14].mxu0  ;;  %1320 = vmatprep.mubr.msk.bf16.mxu1 %vm98_vm0, %v344_v7  ;;  %v294_v22 = vadd.f32 %v1685_v52, %v293_v18  ;;  %v1307_v23 = vpop.f32.mrb[14].mxu1 }
  0xf8   :  { %v241_v20 = vadd.f32 %v1291_v15, %v1685_v52  ;;  %v232_v21 = vpop.f32.mrb[15].mxu0  ;;  %1321 = vmatmul.mubr.msk.bf16.gmra.mrb[24].mxu1 %vm98_vm0, %v345_v5  ;;  %v338_v25 = vmax.f32 %v302_v17, 0.0  ;;  %v305_v26 = vadd.f32 %v1307_v23, %v1685_v52  ;;  %v296_v27 = vpop.f32.mrb[15].mxu1  ;;  %v322_v28 = vmax.f32 %v238_v10, 0.0 }
  0xf9   :  { %v233_v24 = vadd.f32 %v1685_v52, %v232_v21  ;;  %v336_v30 = vmax.f32 %v294_v22, 0.0  ;;  %v297_v31 = vadd.f32 %v1685_v52, %v296_v27  ;;  %v320_v32 = vmax.f32 %v230_v14, 0.0  ;;  %v1388_v52 = vld [vmem:[%s2225_s5] sm:$0xff]  }
  0xfa   :  { %v323_v29 = vmax.f32 %v241_v20, 0.0  ;;  %v339_v34 = vmax.f32 %v305_v26, 0.0  ;;  %1344 = vmatprep.subr.bf16.mxu0 %v1388_v52 }
  0xfb   :  { %v321_v33 = vmax.f32 %v233_v24, 0.0  ;;  %v337_v36 = vmax.f32 %v297_v31, 0.0  ;;  %1345 = vmatpush3.bf16.msra.mxu0 %v1388_v52 }
  0xfc   :  { %v347_v35 = vpack.c.bf16 %v323_v29, %v322_v28  ;;  %v355_v38 = vpack.c.bf16 %v339_v34, %v338_v25 }
  0xfd   :  { %v346_v37 = vpack.c.bf16 %v321_v33, %v320_v32  ;;  %v354_v39 = vpack.c.bf16 %v337_v36, %v336_v30 }
  0xff   :  { %1324 = vmatprep.mubr.msk.bf16.mxu1 %vm98_vm0, %v346_v37 }
 0x100   :  { %1325 = vmatmul.mubr.msk.bf16.gmra.mrb[28].mxu1 %vm98_vm0, %v347_v35 }
 0x101   :  { %1328 = vmatprep.mubr.msk.bf16.mxu1 %vm98_vm0, %v1698_v19  ;;  %v1753_v19 = vld [vmem:[%s2226_s4] ss:$0 sm:$0xff] }
 0x108   :  { %1329 = vmatmul.mubr.msk.bf16.gmra.mrb[32].mxu1 %vm98_vm0, %v1695_v16  ;;  %v1389_v16 = vld [vmem:[%s2225_s5 + $0x8] sm:$0xff]  }
 0x109   :  { %1332 = vmatprep.mubr.msk.bf16.mxu1 %vm98_vm0, %v350_v47  ;;  %1346 = vmatprep.subr.bf16.mxu0 %v1389_v16 }
 0x10a   :  { %1347 = vmatpush3.bf16.msra.mxu0 %v1389_v16 }
 0x110   :  { %1333 = vmatmul.mubr.msk.bf16.gmra.mrb[36].mxu1 %vm98_vm0, %v1709_v44 }
 0x111   :  { %1336 = vmatprep.mubr.msk.bf16.mxu1 %vm98_vm0, %v352_v12 }
 0x118   :  { %1337 = vmatmul.mubr.msk.bf16.gmra.mrb[40].mxu1 %vm98_vm0, %v353_v9 }
 0x119   :  { %1340 = vmatprep.mubr.msk.bf16.mxu1 %vm98_vm0, %v354_v39 }
 0x120   :  { %1341 = vmatmul.mubr.msk.bf16.gmra.mrb[44].mxu1 %vm98_vm0, %v355_v38 }
 0x1bb   :  { %v1314_v40 = vpop.f32.mrb[16].mxu1 }
 0x1bc   :  { %v1756_v41 = vadd.f32 %v1314_v40, %v1753_v19  ;;  %v461_v42 = vpop.f32.mrb[17].mxu1 }
 0x1bd   :  { %v1759_v43 = vadd.f32 %v1753_v19, %v461_v42  ;;  %v1315_v44 = vpop.f32.mrb[18].mxu1 }
 0x1be   :  { %v590_v45 = vand.u32 2147483647, %v1756_v41  ;;  %v1763_v46 = vadd.f32 %v1315_v44, %v1753_v19  ;;  %v464_v47 = vpop.f32.mrb[19].mxu1  ;;  %vm782_vm1 = vcmp.ge.f32.partialorder %v1756_v41, 0.0 }
 0x1bf   :  { %v588_v48 = vand.u32 2147483647, %v1759_v43  ;;  %v1767_v49 = vadd.f32 %v1753_v19, %v464_v47  ;;  %vm780_vm2 = vcmp.ge.f32.partialorder %v1759_v43, 0.0 }
 0x1c0   :  { %v622_v50 = vsub.f32 0.0, %v590_v45  ;;  %v591_v51 = vand.u32 2147483647, %v1763_v46  ;;  %vm783_vm3 = vcmp.ge.f32.partialorder %v1763_v46, 0.0 }
 0x1c1   :  { %v620_v53 = vsub.f32 0.0, %v588_v48  ;;  %v589_v54 = vand.u32 2147483647, %v1767_v49  ;;  %vm781_vm4 = vcmp.ge.f32.partialorder %v1767_v49, 0.0 }
 0x1c2   :  { %v656_v55 = vmul.f32 1.442695, %v622_v50  ;;  %v623_v56 = vsub.f32 0.0, %v591_v51 }
 0x1c3   :  { %v652_v57 = vmul.f32 1.442695, %v620_v53  ;;  %v621_v58 = vsub.f32 0.0, %v589_v54  ;;  %v1318_v59 = vpop.f32.mrb[20].mxu1 }
 0x1c4   :  { %1390 = vpow2.f32 %v656_v55  ;;  %v658_v60 = vmul.f32 1.442695, %v623_v56  ;;  %v1772_v61 = vadd.f32 %v1318_v59, %v1753_v19  ;;  %v477_v62 = vpop.f32.mrb[21].mxu1 }
 0x1c5   :  { %1392 = vpow2.f32 %v652_v57  ;;  %v654_v63 = vmul.f32 1.442695, %v621_v58  ;;  %v1775_v0 = vadd.f32 %v1753_v19, %v477_v62  ;;  %v1319_v1 = vpop.f32.mrb[22].mxu1 }
 0x1c6   :  { %1394 = vpow2.f32 %v658_v60  ;;  %v594_v2 = vand.u32 2147483647, %v1772_v61  ;;  %v1779_v3 = vadd.f32 %v1319_v1, %v1753_v19  ;;  %v480_v4 = vpop.f32.mrb[23].mxu1  ;;  %vm786_vm5 = vcmp.ge.f32.partialorder %v1772_v61, 0.0 }
 0x1c7   :  { %1396 = vpow2.f32 %v654_v63  ;;  %v592_v5 = vand.u32 2147483647, %v1775_v0  ;;  %v1783_v6 = vadd.f32 %v1753_v19, %v480_v4  ;;  %vm784_vm6 = vcmp.ge.f32.partialorder %v1775_v0, 0.0 }
 0x1c8   :  { %v626_v7 = vsub.f32 0.0, %v594_v2  ;;  %v595_v8 = vand.u32 2147483647, %v1779_v3  ;;  %vm787_vm7 = vcmp.ge.f32.partialorder %v1779_v3, 0.0 }
 0x1c9   :  { %v624_v9 = vsub.f32 0.0, %v592_v5  ;;  %v593_v10 = vand.u32 2147483647, %v1783_v6  ;;  %vm785_vm8 = vcmp.ge.f32.partialorder %v1783_v6, 0.0 }
 0x1ca   :  { %v664_v11 = vmul.f32 1.442695, %v626_v7  ;;  %v627_v12 = vsub.f32 0.0, %v595_v8 }
 0x1cb   :  { %v660_v13 = vmul.f32 1.442695, %v624_v9  ;;  %v625_v14 = vsub.f32 0.0, %v593_v10  ;;  %v1322_v15 = vpop.f32.mrb[24].mxu1 }
 0x1cc   :  { %1398 = vpow2.f32 %v664_v11  ;;  %v666_v17 = vmul.f32 1.442695, %v627_v12  ;;  %v1788_v18 = vadd.f32 %v1322_v15, %v1753_v19  ;;  %v493_v20 = vpop.f32.mrb[25].mxu1 }
 0x1cd   :  { %1400 = vpow2.f32 %v660_v13  ;;  %v662_v21 = vmul.f32 1.442695, %v625_v14  ;;  %v1791_v22 = vadd.f32 %v1753_v19, %v493_v20  ;;  %v1323_v23 = vpop.f32.mrb[26].mxu1 }
 0x1ce   :  { %v1793_v24 = vpop.eup %1390  ;;  %1402 = vpow2.f32 %v666_v17  ;;  %v598_v25 = vand.u32 2147483647, %v1788_v18  ;;  %v1797_v26 = vadd.f32 %v1323_v23, %v1753_v19  ;;  %v496_v27 = vpop.f32.mrb[27].mxu1  ;;  %vm790_vm9 = vcmp.ge.f32.partialorder %v1788_v18, 0.0 }
 0x1cf   :  { %v1799_v28 = vpop.eup %1392  ;;  %v718_v29 = vadd.f32 1.0, %v1793_v24  ;;  %1404 = vpow2.f32 %v662_v21  ;;  %v596_v30 = vand.u32 2147483647, %v1791_v22  ;;  %v1811_v38 = vadd.f32 %v1753_v19, %v496_v27 }
 0x1d0   :  { %v1803_v31 = vpop.eup %1394  ;;  %v716_v32 = vadd.f32 1.0, %v1799_v28  ;;  %v630_v33 = vsub.f32 0.0, %v598_v25  ;;  %v599_v34 = vand.u32 2147483647, %v1797_v26  ;;  %vm788_vm10 = vcmp.ge.f32.partialorder %v1791_v22, 0.0 }
 0x1d1   :  { %v1807_v35 = vpop.eup %1396  ;;  %1406 = vrcp.f32 %v718_v29  ;;  %v719_v36 = vadd.f32 1.0, %v1803_v31  ;;  %v628_v37 = vsub.f32 0.0, %v596_v30  ;;  %v597_v42 = vand.u32 2147483647, %v1811_v38 }
 0x1d2   :  { %1408 = vrcp.f32 %v716_v32  ;;  %v717_v39 = vadd.f32 1.0, %v1807_v35  ;;  %v672_v52 = vmul.f32 1.442695, %v630_v33  ;;  %v631_v16 = vsub.f32 0.0, %v599_v34 }
 0x1d3   :  { %1410 = vrcp.f32 %v719_v36  ;;  %v668_v40 = vmul.f32 1.442695, %v628_v37  ;;  %v1326_v44 = vpop.f32.mrb[28].mxu1  ;;  %v629_v50 = vsub.f32 0.0, %v597_v42  ;;  %vm791_vm11 = vcmp.ge.f32.partialorder %v1797_v26, 0.0 }
 0x1d4   :  { %1412 = vrcp.f32 %v717_v39  ;;  %v674_v45 = vmul.f32 1.442695, %v631_v16  ;;  %v1816_v47 = vadd.f32 %v1326_v44, %v1753_v19  ;;  %v509_v48 = vpop.f32.mrb[29].mxu1  ;;  %vm789_vm12 = vcmp.ge.f32.partialorder %v1811_v38, 0.0 }
 0x1d5   :  { %1414 = vpow2.f32 %v672_v52  ;;  %v1819_v51 = vadd.f32 %v1753_v19, %v509_v48  ;;  %v1327_v53 = vpop.f32.mrb[30].mxu1  ;;  %v670_v7 = vmul.f32 1.442695, %v629_v50 }
 0x1d6   :  { %v1821_v54 = vpop.eup %1398  ;;  %1416 = vpow2.f32 %v668_v40  ;;  %v602_v55 = vand.u32 2147483647, %v1816_v47  ;;  %v1825_v56 = vadd.f32 %v1327_v53, %v1753_v19  ;;  %v512_v57 = vpop.f32.mrb[31].mxu1  ;;  %vm794_vm13 = vcmp.ge.f32.partialorder %v1816_v47, 0.0 }
 0x1d7   :  { %v1827_v58 = vpop.eup %1400  ;;  %v722_v59 = vadd.f32 1.0, %v1821_v54  ;;  %1418 = vpow2.f32 %v674_v45  ;;  %v600_v60 = vand.u32 2147483647, %v1819_v51  ;;  %v1843_v14 = vadd.f32 %v1753_v19, %v512_v57 }
 0x1d8   :  { %v1832_v62 = vpop.eup %1402  ;;  %v720_v63 = vadd.f32 1.0, %v1827_v58  ;;  %v634_v1 = vsub.f32 0.0, %v602_v55  ;;  %v603_v2 = vand.u32 2147483647, %v1825_v56  ;;  %vm795_vm14 = vcmp.ge.f32.partialorder %v1825_v56, 0.0 }
 0x1d9   :  { %v1837_v4 = vpop.eup %1404  ;;  %1420 = vrcp.f32 %v722_v59  ;;  %v723_v5 = vadd.f32 1.0, %v1832_v62  ;;  %v632_v8 = vsub.f32 0.0, %v600_v60  ;;  %v601_v30 = vand.u32 2147483647, %v1843_v14 }
 0x1da   :  { %1422 = vrcp.f32 %v720_v63  ;;  %v721_v9 = vadd.f32 1.0, %v1837_v4  ;;  %v680_v10 = vmul.f32 1.442695, %v634_v1  ;;  %v635_v11 = vsub.f32 0.0, %v603_v2 }
 0x1db   :  { %v1407_v12 = vpop.eup %1406  ;;  %1424 = vrcp.f32 %v723_v5  ;;  %v676_v13 = vmul.f32 1.442695, %v632_v8  ;;  %v1330_v15 = vpop.f32.mrb[32].mxu1  ;;  %v633_v16 = vsub.f32 0.0, %v601_v30  ;;  %vm792_vm15 = vcmp.ge.f32.partialorder %v1819_v51, 0.0 }
 0x1dc   :  { %v1409_v17 = vpop.eup %1408  ;;  %v814_v20 = vmul.f32 %v1407_v12, %v1793_v24  ;;  %1426 = vrcp.f32 %v721_v9  ;;  %v682_v21 = vmul.f32 1.442695, %v635_v11  ;;  %v1847_v23 = vadd.f32 %v1330_v15, %v1753_v19  ;;  %v525_v25 = vpop.f32.mrb[33].mxu1 }
 0x1dd   :  { %v1411_v27 = vpop.eup %1410  ;;  %v812_v29 = vmul.f32 %v1409_v17, %v1799_v28  ;;  %1428 = vpow2.f32 %v670_v7  ;;  %v1331_v32 = vpop.f32.mrb[34].mxu1  ;;  %v1874_v57 = vadd.f32 %v1753_v19, %v525_v25 }
 0x1de   :  { %v1413_v33 = vpop.eup %1412  ;;  %v846_v34 = vsel %vm782_vm1, %v1407_v12, %v814_v20  ;;  %v815_v24 = vmul.f32 %v1411_v27, %v1803_v31  ;;  %1430 = vpow2.f32 %v680_v10  ;;  %v606_v36 = vand.u32 2147483647, %v1847_v23  ;;  %v528_v37 = vpop.f32.mrb[35].mxu1 }
 0x1df   :  { %v1856_v39 = vpop.eup %1414  ;;  %v844_v28 = vsel %vm780_vm2, %v1409_v17, %v812_v29  ;;  %v813_v52 = vmul.f32 %v1413_v33, %v1807_v35  ;;  %1432 = vpow2.f32 %v676_v13  ;;  %v678_v35 = vmul.f32 1.442695, %v633_v16 }
 0x1e0   :  { %v1861_v40 = vpop.eup %1416  ;;  %v847_v41 = vsel %vm783_vm3, %v1411_v27, %v815_v24  ;;  %v726_v31 = vadd.f32 1.0, %v1856_v39  ;;  %1434 = vpow2.f32 %v682_v21  ;;  %v638_v42 = vsub.f32 0.0, %v606_v36 }
 0x1e1   :  { %v1866_v44 = vpop.eup %1418  ;;  %v877_v45 = vpack.c.bf16 %v847_v41, %v846_v34  ;;  %v845_v43 = vsel %vm781_vm4, %v1413_v33, %v813_v52  ;;  %v724_v48 = vadd.f32 1.0, %v1861_v40  ;;  %v1877_v59 = vadd.f32 %v1331_v32, %v1753_v19 }
 0x1e2   :  { %v876_v50 = vpack.c.bf16 %v845_v43, %v844_v28  ;;  %1436 = vrcp.f32 %v726_v31  ;;  %v727_v53 = vadd.f32 1.0, %v1866_v44  ;;  %v688_v55 = vmul.f32 1.442695, %v638_v42 }
 0x1e3   :  { %v1421_v46 = vpop.eup %1420  ;;  %1438 = vrcp.f32 %v724_v48  ;;  %v1334_v49 = vpop.f32.mrb[36].mxu1  ;;  %v1882_v1 = vadd.f32 %v1753_v19, %v528_v37  ;;  %v604_v8 = vand.u32 2147483647, %v1874_v57  ;;  %v607_v11 = vand.u32 2147483647, %v1877_v59 }
 0x1e4   :  { %v1423_v60 = vpop.eup %1422  ;;  %v818_v63 = vmul.f32 %v1421_v46, %v1821_v54  ;;  %1440 = vrcp.f32 %v727_v53  ;;  %v541_v2 = vpop.f32.mrb[37].mxu1  ;;  %1348 = vmatprep.mubr.msk.bf16.mxu0 %vm98_vm0, %v876_v50  ;;  %v1898_v20 = vadd.f32 %v1334_v49, %v1753_v19  ;;  %vm793_vm1 = vcmp.ge.f32.partialorder %v1843_v14, 0.0 }
 0x1e5   :  { %v1425_v5 = vpop.eup %1424  ;;  %v816_v7 = vmul.f32 %v1423_v60, %v1827_v58  ;;  %1442 = vpow2.f32 %v678_v35  ;;  %v1335_v9 = vpop.f32.mrb[38].mxu1  ;;  %1349 = vmatmul.mubr.msk.bf16.vlgmr.msra.gmra.mrb[16].mxu0 %vm98_vm0, %v877_v45  ;;  %v636_v17 = vsub.f32 0.0, %v604_v8  ;;  %v639_v27 = vsub.f32 0.0, %v607_v11 }
 0x1e6   :  { %v1427_v54 = vpop.eup %1426  ;;  %v819_v10 = vmul.f32 %v1425_v5, %v1832_v62  ;;  %1444 = vpow2.f32 %v688_v55  ;;  %v544_v12 = vpop.f32.mrb[39].mxu1  ;;  %v850_v58 = vsel %vm786_vm5, %v1421_v46, %v818_v63  ;;  %v605_v29 = vand.u32 2147483647, %v1882_v1 }
 0x1e7   :  { %v1892_v13 = vpop.eup %1428  ;;  %v817_v15 = vmul.f32 %v1427_v54, %v1837_v4  ;;  %v848_v61 = vsel %vm784_vm6, %v1423_v60, %v816_v7  ;;  %v684_v36 = vmul.f32 1.442695, %v636_v17  ;;  %v690_v28 = vmul.f32 1.442695, %v639_v27 }
 0x1e8   :  { %v1900_v21 = vpop.eup %1430  ;;  %v851_v62 = vsel %vm787_vm7, %v1425_v5, %v819_v10  ;;  %v725_v25 = vadd.f32 1.0, %v1892_v13  ;;  %v637_v52 = vsub.f32 0.0, %v605_v29  ;;  %v610_v6 = vand.u32 2147483647, %v1898_v20 }
 0x1e9   :  { %v1906_v30 = vpop.eup %1432  ;;  %v879_v4 = vpack.c.bf16 %v851_v62, %v850_v58  ;;  %v849_v32 = vsel %vm785_vm8, %v1427_v54, %v817_v15  ;;  %v730_v33 = vadd.f32 1.0, %v1900_v21  ;;  %v1919_v41 = vadd.f32 %v1753_v19, %v541_v2 }
 0x1ea   :  { %v1913_v34 = vpop.eup %1434  ;;  %v878_v3 = vpack.c.bf16 %v849_v32, %v848_v61  ;;  %1446 = vrcp.f32 %v725_v25  ;;  %v728_v24 = vadd.f32 1.0, %v1906_v30  ;;  %v686_v43 = vmul.f32 1.442695, %v637_v52 }
 0x1eb   :  { %1448 = vrcp.f32 %v730_v33  ;;  %v731_v37 = vadd.f32 1.0, %v1913_v34  ;;  %v1338_v0 = vpop.f32.mrb[40].mxu1  ;;  %v1924_v48 = vadd.f32 %v1335_v9, %v1753_v19  ;;  %v642_v53 = vsub.f32 0.0, %v610_v6 }
 0x1ec   :  { %v1437_v16 = vpop.eup %1436  ;;  %1450 = vrcp.f32 %v728_v24  ;;  %v557_v31 = vpop.f32.mrb[41].mxu1  ;;  %1352 = vmatprep.mubr.msk.bf16.mxu0 %vm98_vm0, %v878_v3  ;;  %v608_v55 = vand.u32 2147483647, %v1919_v41  ;;  %v1949_v58 = vadd.f32 %v1338_v0, %v1753_v19  ;;  %vm798_vm2 = vcmp.ge.f32.partialorder %v1847_v23, 0.0 }
 0x1ed   :  { %v1439_v42 = vpop.eup %1438  ;;  %v822_v45 = vmul.f32 %v1437_v16, %v1856_v39  ;;  %1452 = vrcp.f32 %v731_v37  ;;  %v1926_v35 = vpop.f32.mrb[42].mxu1  ;;  %1353 = vmatmul.mubr.msk.bf16.gmra.mrb[20].mxu0 %vm98_vm0, %v879_v4  ;;  %v696_v63 = vmul.f32 1.442695, %v642_v53  ;;  %v611_v8 = vand.u32 2147483647, %v1924_v48 }
 0x1ee   :  { %v1441_v50 = vpop.eup %1440  ;;  %1454 = vpow2.f32 %v684_v36  ;;  %v1931_v46 = vpop.f32.mrb[43].mxu1  ;;  %v640_v7 = vsub.f32 0.0, %v608_v55  ;;  %v820_v54 = vmul.f32 %v1439_v42, %v1861_v40  ;;  %v1954_v25 = vadd.f32 %v1753_v19, %v557_v31 }
 0x1ef   :  { %v1933_v49 = vpop.eup %1442  ;;  %v823_v39 = vmul.f32 %v1441_v50, %v1866_v44  ;;  %1456 = vpow2.f32 %v690_v28  ;;  %v854_v2 = vsel %vm790_vm9, %v1437_v16, %v822_v45  ;;  %v1945_v44 = vadd.f32 %v1753_v19, %v544_v12 }
 0x1f0   :  { %v1938_v60 = vpop.eup %1444  ;;  %v729_v18 = vadd.f32 1.0, %v1933_v49  ;;  %1458 = vpow2.f32 %v686_v43  ;;  %v692_v10 = vmul.f32 1.442695, %v640_v7  ;;  %v643_v11 = vsub.f32 0.0, %v611_v8 }
 0x1f1   :  { %v855_v5 = vsel %vm791_vm11, %v1441_v50, %v823_v39  ;;  %v734_v26 = vadd.f32 1.0, %v1938_v60  ;;  %v609_v62 = vand.u32 2147483647, %v1945_v44  ;;  %v614_v61 = vand.u32 2147483647, %v1949_v58 }
 0x1f2   :  { %v881_v9 = vpack.c.bf16 %v855_v5, %v854_v2  ;;  %1460 = vrcp.f32 %v729_v18  ;;  %v698_v40 = vmul.f32 1.442695, %v643_v11  ;;  %v612_v24 = vand.u32 2147483647, %v1954_v25 }
 0x1f3   :  { %v1342_v15 = vpop.f32.mrb[44].mxu1  ;;  %1462 = vpow2.f32 %v696_v63  ;;  %v641_v3 = vsub.f32 0.0, %v609_v62  ;;  %v852_v28 = vsel %vm788_vm10, %v1439_v42, %v820_v54  ;;  %v646_v52 = vsub.f32 0.0, %v614_v61 }
 0x1f4   :  { %v1447_v17 = vpop.eup %1446  ;;  %v573_v27 = vpop.f32.mrb[45].mxu1  ;;  %1464 = vpow2.f32 %v692_v10  ;;  %v644_v42 = vsub.f32 0.0, %v612_v24  ;;  %v1985_v39 = vadd.f32 %v1926_v35, %v1753_v19  ;;  %v1989_v18 = vadd.f32 %v1753_v19, %v1931_v46 }
 0x1f5   :  { %v1449_v12 = vpop.eup %1448  ;;  %v821_v29 = vmul.f32 %v1447_v17, %v1892_v13  ;;  %v1343_v4 = vpop.f32.mrb[46].mxu1  ;;  %1466 = vrcp.f32 %v734_v26  ;;  %v694_v6 = vmul.f32 1.442695, %v641_v3  ;;  %v704_v56 = vmul.f32 1.442695, %v646_v52 }
 0x1f6   :  { %v1451_v32 = vpop.eup %1450  ;;  %v826_v33 = vmul.f32 %v1449_v12, %v1900_v21  ;;  %v1960_v36 = vpop.f32.mrb[47].mxu1  ;;  %1468 = vpow2.f32 %v698_v40  ;;  %v700_v47 = vmul.f32 1.442695, %v644_v42  ;;  %v1994_v2 = vadd.f32 %v1342_v15, %v1753_v19 }
 0x1f7   :  { %v1453_v37 = vpop.eup %1452  ;;  %v853_v13 = vsel %vm789_vm12, %v1447_v17, %v821_v29  ;;  %v824_v22 = vmul.f32 %v1451_v32, %v1906_v30  ;;  %1470 = vpow2.f32 %v694_v6  ;;  %v615_v7 = vand.u32 2147483647, %v1985_v39 }
 0x1f8   :  { %v1966_v0 = vpop.eup %1454  ;;  %v880_v16 = vpack.c.bf16 %v853_v13, %v852_v28  ;;  %v827_v21 = vmul.f32 %v1453_v37, %v1913_v34  ;;  %v858_v45 = vsel %vm794_vm13, %v1449_v12, %v826_v33  ;;  %v2000_v35 = vadd.f32 %v1753_v19, %v573_v27 }
 0x1f9   :  { %v1970_v31 = vpop.eup %1456  ;;  %v732_v38 = vadd.f32 1.0, %v1966_v0  ;;  %v856_v51 = vsel %vm792_vm15, %v1451_v32, %v824_v22  ;;  %v647_v10 = vsub.f32 0.0, %v615_v7  ;;  %v2008_v11 = vadd.f32 %v1343_v4, %v1753_v19 }
 0x1fa   :  { %v1976_v43 = vpop.eup %1458  ;;  %v859_v50 = vsel %vm795_vm14, %v1453_v37, %v827_v21  ;;  %v735_v53 = vadd.f32 1.0, %v1970_v31  ;;  %1356 = vmatprep.mubr.msk.bf16.mxu0 %vm98_vm0, %v880_v16  ;;  %v618_v62 = vand.u32 2147483647, %v1994_v2  ;;  %vm796_vm3 = vcmp.ge.f32.partialorder %v1874_v57, 0.0 }
 0x1fb   :  { %v883_v34 = vpack.c.bf16 %v859_v50, %v858_v45  ;;  %1472 = vrcp.f32 %v732_v38  ;;  %v733_v55 = vadd.f32 1.0, %v1976_v43  ;;  %1357 = vmatmul.mubr.msk.bf16.gmra.mrb[24].mxu0 %vm98_vm0, %v881_v9  ;;  %vm799_vm4 = vcmp.ge.f32.partialorder %v1877_v59, 0.0 }
 0x1fc   :  { %v1461_v30 = vpop.eup %1460  ;;  %1474 = vrcp.f32 %v735_v53  ;;  %v706_v12 = vmul.f32 1.442695, %v647_v10  ;;  %v650_v40 = vsub.f32 0.0, %v618_v62  ;;  %v616_v61 = vand.u32 2147483647, %v2000_v35 }
 0x1fd   :  { %v825_v63 = vmul.f32 %v1461_v30, %v1933_v49  ;;  %1476 = vrcp.f32 %v733_v55  ;;  %v1996_v5 = vpop.eup %1462  ;;  %v613_v49 = vand.u32 2147483647, %v1989_v18  ;;  %v619_v33 = vand.u32 2147483647, %v2008_v11 }
 0x1fe   :  { %1478 = vpow2.f32 %v704_v56  ;;  %v2002_v8 = vpop.eup %1464  ;;  %v738_v14 = vadd.f32 1.0, %v1996_v5  ;;  %v2021_v3 = vadd.f32 %v1753_v19, %v1960_v36  ;;  %v712_v28 = vmul.f32 1.442695, %v650_v40 }
 0x1ff   :  { %v857_v46 = vsel %vm793_vm1, %v1461_v30, %v825_v63  ;;  %1480 = vpow2.f32 %v700_v47  ;;  %v1467_v9 = vpop.eup %1466  ;;  %v736_v54 = vadd.f32 1.0, %v2002_v8  ;;  %v645_v17 = vsub.f32 0.0, %v613_v49 }
 0x200   :  { %v882_v26 = vpack.c.bf16 %v857_v46, %v856_v51  ;;  %v1469_v15 = vpop.eup %1468  ;;  %1482 = vrcp.f32 %v738_v14  ;;  %v830_v32 = vmul.f32 %v1467_v9, %v1938_v60  ;;  %v648_v13 = vsub.f32 0.0, %v616_v61 }
 0x201   :  { %v739_v27 = vadd.f32 1.0, %v1469_v15  ;;  %1484 = vrcp.f32 %v736_v54  ;;  %v702_v29 = vmul.f32 1.442695, %v645_v17  ;;  %v1471_v4 = vpop.eup %1470  ;;  %v651_v21 = vsub.f32 0.0, %v619_v33 }
 0x202   :  { %1360 = vmatprep.mubr.msk.bf16.mxu0 %vm98_vm0, %v882_v26  ;;  %v737_v37 = vadd.f32 1.0, %v1471_v4  ;;  %v617_v6 = vand.u32 2147483647, %v2021_v3  ;;  %vm797_vm5 = vcmp.ge.f32.partialorder %v1882_v1, 0.0  ;;  %v708_v19 = vmul.f32 1.442695, %v648_v13 }
 0x203   :  { %1361 = vmatmul.mubr.msk.bf16.gmra.mrb[28].mxu0 %vm98_vm0, %v883_v34  ;;  %1486 = vrcp.f32 %v739_v27  ;;  %v862_v22 = vsel %vm798_vm2, %v1467_v9, %v830_v32  ;;  %v714_v42 = vmul.f32 1.442695, %v651_v21  ;;  %vm802_vm6 = vcmp.ge.f32.partialorder %v1898_v20, 0.0 }
 0x204   :  { %1488 = vpow2.f32 %v706_v12  ;;  %vm803_vm7 = vcmp.ge.f32.partialorder %v1924_v48, 0.0  ;;  %vm800_vm8 = vcmp.ge.f32.partialorder %v1919_v41, 0.0  ;;  %vm801_vm9 = vcmp.ge.f32.partialorder %v1945_v44, 0.0 }
 0x205   :  { %v1473_v24 = vpop.eup %1472  ;;  %1490 = vpow2.f32 %v702_v29  ;;  %vm806_vm10 = vcmp.ge.f32.partialorder %v1949_v58, 0.0  ;;  %vm807_vm11 = vcmp.ge.f32.partialorder %v1985_v39, 0.0  ;;  %vm804_vm12 = vcmp.ge.f32.partialorder %v1954_v25, 0.0 }
 0x206   :  { %v1475_v52 = vpop.eup %1474  ;;  %v828_v16 = vmul.f32 %v1473_v24, %v1966_v0  ;;  %1492 = vrcp.f32 %v737_v37  ;;  %vm805_vm13 = vcmp.ge.f32.partialorder %v1989_v18, 0.0  ;;  %vm810_vm14 = vcmp.ge.f32.partialorder %v1994_v2, 0.0  ;;  %v2059_v2 = vld [vmem:[%s2227_s6] ss:$0 sm:$0xff] }
 0x207   :  { %v1477_v60 = vpop.eup %1476  ;;  %v831_v45 = vmul.f32 %v1475_v52, %v1970_v31  ;;  %1494 = vpow2.f32 %v712_v28  ;;  %v649_v31 = vsub.f32 0.0, %v617_v6  ;;  %vm811_vm15 = vcmp.ge.f32.partialorder %v2008_v11, 0.0 }
 0x208   :  { %v1479_v36 = vpop.eup %1478  ;;  %v829_v38 = vmul.f32 %v1477_v60, %v1976_v43  ;;  %v860_v50 = vsel %vm796_vm3, %v1473_v24, %v828_v16  ;;  %1496 = vpow2.f32 %v708_v19  ;;  %vm808_vm1 = vcmp.ge.f32.partialorder %v2000_v35, 0.0 }
 0x209   :  { %v1481_v0 = vpop.eup %1480  ;;  %v863_v53 = vsel %vm799_vm4, %v1475_v52, %v831_v45  ;;  %v742_v34 = vadd.f32 1.0, %v1479_v36  ;;  %1498 = vpow2.f32 %v714_v42  ;;  %v710_v30 = vmul.f32 1.442695, %v649_v31 }
 0x20a   :  { %v885_v1 = vpack.c.bf16 %v863_v53, %v862_v22  ;;  %v861_v56 = vsel %vm797_vm5, %v1477_v60, %v829_v38  ;;  %v1483_v55 = vpop.eup %1482  ;;  %v740_v47 = vadd.f32 1.0, %v1481_v0  ;;  %vm809_vm2 = vcmp.ge.f32.partialorder %v2021_v3, 0.0 }
 0x20b   :  { %v884_v23 = vpack.c.bf16 %v861_v56, %v860_v50  ;;  %v1485_v43 = vpop.eup %1484  ;;  %v834_v63 = vmul.f32 %v1483_v55, %v1996_v5  ;;  %1500 = vpow2.f32 %v710_v30  ;;  %vm1124_vm3 = vcmask 31744  }
 0x20c   :  { %1502 = vrcp.f32 %v742_v34  ;;  %v832_v46 = vmul.f32 %v1485_v43, %v2002_v8 }
 0x20d   :  { %1364 = vmatprep.mubr.msk.bf16.mxu0 %vm98_vm0, %v884_v23  ;;  %v1487_v57 = vpop.eup %1486  ;;  %1504 = vrcp.f32 %v740_v47  ;;  %v866_v5 = vsel %vm802_vm6, %v1483_v55, %v834_v63 }
 0x20e   :  { %1365 = vmatmul.mubr.msk.bf16.gmra.mrb[32].mxu0 %vm98_vm0, %v885_v1  ;;  %v1489_v59 = vpop.eup %1488  ;;  %v835_v51 = vmul.f32 %v1487_v57, %v1469_v15  ;;  %v864_v8 = vsel %vm800_vm8, %v1485_v43, %v832_v46 }
 0x20f   :  { %v1491_v7 = vpop.eup %1490  ;;  %v743_v14 = vadd.f32 1.0, %v1489_v59 }
 0x210   :  { %v1493_v49 = vpop.eup %1492  ;;  %v867_v9 = vsel %vm803_vm7, %v1487_v57, %v835_v51  ;;  %v741_v26 = vadd.f32 1.0, %v1491_v7 }
 0x211   :  { %v1495_v54 = vpop.eup %1494  ;;  %v887_v10 = vpack.c.bf16 %v867_v9, %v866_v5  ;;  %v833_v17 = vmul.f32 %v1493_v49, %v1471_v4  ;;  %1506 = vrcp.f32 %v743_v14 }
 0x212   :  { %v1497_v62 = vpop.eup %1496  ;;  %1508 = vrcp.f32 %v741_v26  ;;  %v746_v20 = vadd.f32 1.0, %v1495_v54 }
 0x213   :  { %v1499_v15 = vpop.eup %1498  ;;  %v865_v27 = vsel %vm801_vm9, %v1493_v49, %v833_v17  ;;  %v744_v48 = vadd.f32 1.0, %v1497_v62 }
 0x214   :  { %v886_v12 = vpack.c.bf16 %v865_v27, %v864_v8  ;;  %1510 = vrcp.f32 %v746_v20  ;;  %v747_v29 = vadd.f32 1.0, %v1499_v15 }
 0x215   :  { %1512 = vrcp.f32 %v744_v48  ;;  %v1501_v40 = vpop.eup %1500 }
 0x216   :  { %1514 = vrcp.f32 %v747_v29  ;;  %1368 = vmatprep.mubr.msk.bf16.mxu0 %vm98_vm0, %v886_v12  ;;  %v1503_v61 = vpop.eup %1502  ;;  %v745_v4 = vadd.f32 1.0, %v1501_v40 }
 0x217   :  { %1369 = vmatmul.mubr.msk.bf16.gmra.mrb[36].mxu0 %vm98_vm0, %v887_v10  ;;  %v1505_v41 = vpop.eup %1504  ;;  %v838_v44 = vmul.f32 %v1503_v61, %v1479_v36 }
 0x218   :  { %1516 = vrcp.f32 %v745_v4  ;;  %v836_v33 = vmul.f32 %v1505_v41, %v1481_v0 }
 0x219   :  { %v870_v52 = vsel %vm806_vm10, %v1503_v61, %v838_v44 }
 0x21a   :  { %v868_v6 = vsel %vm804_vm12, %v1505_v41, %v836_v33 }
 0x21b   :  { %v1507_v32 = vpop.eup %1506 }
 0x21c   :  { %v1509_v24 = vpop.eup %1508  ;;  %v839_v37 = vmul.f32 %v1507_v32, %v1489_v59 }
 0x21d   :  { %v837_v28 = vmul.f32 %v1509_v24, %v1491_v7 }
 0x21e   :  { %v1511_v13 = vpop.eup %1510  ;;  %v871_v16 = vsel %vm807_vm11, %v1507_v32, %v839_v37 }
 0x21f   :  { %v1513_v21 = vpop.eup %1512  ;;  %v889_v60 = vpack.c.bf16 %v871_v16, %v870_v52  ;;  %v869_v45 = vsel %vm805_vm13, %v1509_v24, %v837_v28  ;;  %v842_v19 = vmul.f32 %v1511_v13, %v1495_v54 }
 0x220   :  { %v1515_v36 = vpop.eup %1514  ;;  %v888_v22 = vpack.c.bf16 %v869_v45, %v868_v6  ;;  %v840_v58 = vmul.f32 %v1513_v21, %v1497_v62 }
 0x221   :  { %v843_v38 = vmul.f32 %v1515_v36, %v1499_v15  ;;  %v874_v25 = vsel %vm810_vm14, %v1511_v13, %v842_v19 }
 0x222   :  { %1372 = vmatprep.mubr.msk.bf16.mxu0 %vm98_vm0, %v888_v22  ;;  %v1517_v39 = vpop.eup %1516  ;;  %v872_v50 = vsel %vm808_vm1, %v1513_v21, %v840_v58 }
 0x223   :  { %v875_v42 = vsel %vm811_vm15, %v1515_v36, %v843_v38  ;;  %1373 = vmatmul.mubr.msk.bf16.gmra.mrb[40].mxu0 %vm98_vm0, %v889_v60  ;;  %v841_v0 = vmul.f32 %v1517_v39, %v1501_v40 }
 0x224   :  { %v891_v18 = vpack.c.bf16 %v875_v42, %v874_v25 }
 0x225   :  { %v873_v53 = vsel %vm809_vm2, %v1517_v39, %v841_v0 }
 0x226   :  { %v890_v31 = vpack.c.bf16 %v873_v53, %v872_v50 }
 0x228   :  { %1376 = vmatprep.mubr.msk.bf16.mxu0 %vm98_vm0, %v890_v31 }
 0x22b   :  { %1377 = vmatmul.mubr.msk.bf16.gmra.mrb[44].mxu0 %vm98_vm0, %v891_v18 }
 0x2b8   :  { %v1350_v11 = vpop.f32.mrb[16].mxu0 }
 0x2b9   :  { %v1006_v1 = vadd.f32 %v1350_v11, %v2059_v2  ;;  %v997_v56 = vpop.f32.mrb[17].mxu0 }
 0x2ba   :  { %v998_v35 = vadd.f32 %v2059_v2, %v997_v56  ;;  %v1351_v3 = vpop.f32.mrb[18].mxu0 }
 0x2bb   :  { %1127 = vst.msk [vmem:[%s2228_s7 + $0x10] sm:$0xff] %vm1124_vm3, %v1006_v1  ;;  %v1009_v34 = vadd.f32 %v1351_v3, %v2059_v2  ;;  %v1000_v55 = vpop.f32.mrb[19].mxu0 }
 0x2bc   :  { %1125 = vst.msk [vmem:[%s2228_s7] sm:$0xff] %vm1124_vm3, %v998_v35  ;;  %v1001_v23 = vadd.f32 %v2059_v2, %v1000_v55 }
 0x2bd   :  { %1128 = vst.msk [vmem:[%s2228_s7 + $0x18] sm:$0xff] %vm1124_vm3, %v1009_v34 }
 0x2be   :  { %1126 = vst.msk [vmem:[%s2228_s7 + $0x8] sm:$0xff] %vm1124_vm3, %v1001_v23 }
 0x2c0   :  { %v1354_v47 = vpop.f32.mrb[20].mxu0 }
 0x2c1   :  { %v1022_v30 = vadd.f32 %v1354_v47, %v2059_v2  ;;  %v1013_v43 = vpop.f32.mrb[21].mxu0 }
 0x2c2   :  { %v1014_v63 = vadd.f32 %v2059_v2, %v1013_v43  ;;  %v1355_v57 = vpop.f32.mrb[22].mxu0 }
 0x2c3   :  { %1131 = vst.msk [vmem:[%s2228_s7 + $0x30] sm:$0xff] %vm1124_vm3, %v1022_v30  ;;  %v1025_v59 = vadd.f32 %v1355_v57, %v2059_v2  ;;  %v1016_v51 = vpop.f32.mrb[23].mxu0 }
 0x2c4   :  { %1129 = vst.msk [vmem:[%s2228_s7 + $0x20] sm:$0xff] %vm1124_vm3, %v1014_v63  ;;  %v1017_v7 = vadd.f32 %v2059_v2, %v1016_v51 }
 0x2c5   :  { %1132 = vst.msk [vmem:[%s2228_s7 + $0x38] sm:$0xff] %vm1124_vm3, %v1025_v59 }
 0x2c6   :  { %1130 = vst.msk [vmem:[%s2228_s7 + $0x28] sm:$0xff] %vm1124_vm3, %v1017_v7 }
 0x2ce   :  { %v1358_v46 = vpop.f32.mrb[24].mxu0 }
 0x2cf   :  { %v1038_v14 = vadd.f32 %v1358_v46, %v2059_v2  ;;  %v1029_v49 = vpop.f32.mrb[25].mxu0 }
 0x2d0   :  { %v1030_v5 = vadd.f32 %v2059_v2, %v1029_v49  ;;  %v1359_v9 = vpop.f32.mrb[26].mxu0 }
 0x2d1   :  { %1135 = vst.msk [vmem:[%s2228_s7 + $0x50] sm:$0xff] %vm1124_vm3, %v1038_v14  ;;  %v1041_v26 = vadd.f32 %v1359_v9, %v2059_v2  ;;  %v1032_v54 = vpop.f32.mrb[27].mxu0 }
 0x2d2   :  { %1133 = vst.msk [vmem:[%s2228_s7 + $0x40] sm:$0xff] %vm1124_vm3, %v1030_v5  ;;  %v1033_v10 = vadd.f32 %v2059_v2, %v1032_v54 }
 0x2d3   :  { %1136 = vst.msk [vmem:[%s2228_s7 + $0x58] sm:$0xff] %vm1124_vm3, %v1041_v26 }
 0x2d4   :  { %1134 = vst.msk [vmem:[%s2228_s7 + $0x48] sm:$0xff] %vm1124_vm3, %v1033_v10 }
 0x2d6   :  { %v1362_v17 = vpop.f32.mrb[28].mxu0 }
 0x2d7   :  { %v1054_v62 = vadd.f32 %v1362_v17, %v2059_v2  ;;  %v1045_v20 = vpop.f32.mrb[29].mxu0 }
 0x2d8   :  { %v1046_v15 = vadd.f32 %v2059_v2, %v1045_v20  ;;  %v1363_v8 = vpop.f32.mrb[30].mxu0 }
 0x2d9   :  { %1139 = vst.msk [vmem:[%s2228_s7 + $0x70] sm:$0xff] %vm1124_vm3, %v1054_v62  ;;  %v1057_v27 = vadd.f32 %v1363_v8, %v2059_v2  ;;  %v1048_v48 = vpop.f32.mrb[31].mxu0 }
 0x2da   :  { %1137 = vst.msk [vmem:[%s2228_s7 + $0x60] sm:$0xff] %vm1124_vm3, %v1046_v15  ;;  %v1049_v12 = vadd.f32 %v2059_v2, %v1048_v48 }
 0x2db   :  { %1140 = vst.msk [vmem:[%s2228_s7 + $0x78] sm:$0xff] %vm1124_vm3, %v1057_v27 }
 0x2dc   :  { %1138 = vst.msk [vmem:[%s2228_s7 + $0x68] sm:$0xff] %vm1124_vm3, %v1049_v12 }
 0x2e1   :  { %v1366_v29 = vpop.f32.mrb[32].mxu0 }
 0x2e2   :  { %v1070_v40 = vadd.f32 %v1366_v29, %v2059_v2  ;;  %v1061_v61 = vpop.f32.mrb[33].mxu0 }
 0x2e3   :  { %v1062_v4 = vadd.f32 %v2059_v2, %v1061_v61  ;;  %v1367_v41 = vpop.f32.mrb[34].mxu0 }
 0x2e4   :  { %1143 = vst.msk [vmem:[%s2228_s7 + $0x90] sm:$0xff] %vm1124_vm3, %v1070_v40  ;;  %v1073_v44 = vadd.f32 %v1367_v41, %v2059_v2  ;;  %v1064_v32 = vpop.f32.mrb[35].mxu0 }
 0x2e5   :  { %1141 = vst.msk [vmem:[%s2228_s7 + $0x80] sm:$0xff] %vm1124_vm3, %v1062_v4  ;;  %v1065_v33 = vadd.f32 %v2059_v2, %v1064_v32 }
 0x2e6   :  { %1144 = vst.msk [vmem:[%s2228_s7 + $0x98] sm:$0xff] %vm1124_vm3, %v1073_v44 }
 0x2e7   :  { %1142 = vst.msk [vmem:[%s2228_s7 + $0x88] sm:$0xff] %vm1124_vm3, %v1065_v33 }
 0x2ea   :  { %v1370_v24 = vpop.f32.mrb[36].mxu0 }
 0x2eb   :  { %v1086_v37 = vadd.f32 %v1370_v24, %v2059_v2  ;;  %v1077_v28 = vpop.f32.mrb[37].mxu0 }
 0x2ec   :  { %v1078_v13 = vadd.f32 %v2059_v2, %v1077_v28  ;;  %v1371_v52 = vpop.f32.mrb[38].mxu0 }
 0x2ed   :  { %1147 = vst.msk [vmem:[%s2228_s7 + $0xb0] sm:$0xff] %vm1124_vm3, %v1086_v37  ;;  %v1089_v16 = vadd.f32 %v1371_v52, %v2059_v2  ;;  %v1080_v21 = vpop.f32.mrb[39].mxu0 }
 0x2ee   :  { %1145 = vst.msk [vmem:[%s2228_s7 + $0xa0] sm:$0xff] %vm1124_vm3, %v1078_v13  ;;  %v1081_v6 = vadd.f32 %v2059_v2, %v1080_v21 }
 0x2ef   :  { %1148 = vst.msk [vmem:[%s2228_s7 + $0xb8] sm:$0xff] %vm1124_vm3, %v1089_v16 }
 0x2f0   :  { %1146 = vst.msk [vmem:[%s2228_s7 + $0xa8] sm:$0xff] %vm1124_vm3, %v1081_v6 }
 0x2f6   :  { %v1374_v60 = vpop.f32.mrb[40].mxu0 }
 0x2f7   :  { %v1102_v45 = vadd.f32 %v1374_v60, %v2059_v2  ;;  %v1093_v19 = vpop.f32.mrb[41].mxu0 }
 0x2f8   :  { %v1094_v36 = vadd.f32 %v2059_v2, %v1093_v19  ;;  %v1375_v22 = vpop.f32.mrb[42].mxu0 }
 0x2f9   :  { %1151 = vst.msk [vmem:[%s2228_s7 + $0xd0] sm:$0xff] %vm1124_vm3, %v1102_v45  ;;  %v1105_v38 = vadd.f32 %v1375_v22, %v2059_v2  ;;  %v1096_v58 = vpop.f32.mrb[43].mxu0 }
 0x2fa   :  { %1149 = vst.msk [vmem:[%s2228_s7 + $0xc0] sm:$0xff] %vm1124_vm3, %v1094_v36  ;;  %v1097_v39 = vadd.f32 %v2059_v2, %v1096_v58 }
 0x2fb   :  { %1152 = vst.msk [vmem:[%s2228_s7 + $0xd8] sm:$0xff] %vm1124_vm3, %v1105_v38 }
 0x2fc   :  { %1150 = vst.msk [vmem:[%s2228_s7 + $0xc8] sm:$0xff] %vm1124_vm3, %v1097_v39 }
 0x2fe   :  { %v1378_v25 = vpop.f32.mrb[44].mxu0 }
 0x2ff   :  { %v1118_v42 = vadd.f32 %v1378_v25, %v2059_v2  ;;  %v1109_v18 = vpop.f32.mrb[45].mxu0 }
 0x300   :  { %v1110_v0 = vadd.f32 %v2059_v2, %v1109_v18  ;;  %v1379_v50 = vpop.f32.mrb[46].mxu0 }
 0x301   :  { %1155 = vst.msk [vmem:[%s2228_s7 + $0xf0] sm:$0xff] %vm1124_vm3, %v1118_v42  ;;  %v1121_v53 = vadd.f32 %v1379_v50, %v2059_v2  ;;  %v1112_v31 = vpop.f32.mrb[47].mxu0 }
 0x302   :  { %1153 = vst.msk [vmem:[%s2228_s7 + $0xe0] sm:$0xff] %vm1124_vm3, %v1110_v0  ;;  %v1113_v11 = vadd.f32 %v2059_v2, %v1112_v31 }
 0x303   :  { %1156 = vst.msk [vmem:[%s2228_s7 + $0xf8] sm:$0xff] %vm1124_vm3, %v1121_v53 }
 0x304   :  { %1154 = vst.msk [vmem:[%s2228_s7 + $0xe8] sm:$0xff] %vm1124_vm3, %v1113_v11 }

</bundles_post_ra>
